<compile_context>
chip_gen: v5e
topology: v5e:2x2
jax: 0.10.0
libtpu: 0.0.40
codegen_flags: <defaults>
</compile_context>

<pallas_src>
import jax
import jax.numpy as jnp
from jax.experimental import pallas as pl
from jax.experimental.pallas import tpu as pltpu

_K_CHUNK = 512  # adj columns upcast per MXU pass (bounds the f32 scratch)


def gppt_forward_kernel(adj_ref, invdeg_ref, h_ref, w_ref, out_ref, fea_ref):
    TM, N = adj_ref.shape
    D = h_ref.shape[1]
    K = out_ref.shape[1]
    C = w_ref.shape[1] // (K + 1)          # fused weight width = C + C*K

    # --- SimpleMeanConv: mean over in-neighbours as a row-tiled matmul ------
    # int8 adj tile is upcast to f32 per contraction chunk (never a full
    # (TM, N) f32 copy), accumulated in f32 on the MXU.
    nk = _K_CHUNK if N > _K_CHUNK else N
    acc = jnp.zeros((TM, D), jnp.float32)
    start = 0
    while start < N:                        # static Python loop (N, nk static)
        size = min(nk, N - start)
        a = adj_ref[:, start:start + size].astype(jnp.float32)
        acc = acc + jnp.dot(a, h_ref[start:start + size, :],
                            preferred_element_type=jnp.float32)
        start += size
    h_agg = acc * invdeg_ref[...]           # (TM, D) * (TM, 1), 1/deg precomputed
    fea_ref[...] = h_agg                    # == self.fea

    # --- StructureToken + ALL TaskToken heads in one fused MXU pass ---------
    cols = jnp.dot(h_agg, w_ref[...], preferred_element_type=jnp.float32)
    scores = cols[:, :C]                    # StructureToken logits (TM, C)

    # torch.argmax tie-break = first max.
    col_ids = jax.lax.broadcasted_iota(jnp.int32, scores.shape, 1)
    max_s = jnp.max(scores, axis=1, keepdims=True)
    idx = jnp.min(jnp.where(scores == max_s, col_ids, C), axis=1, keepdims=True)

    # Per-row TaskToken head select (C small, static unroll).
    out = jnp.zeros(out_ref.shape, out_ref.dtype)
    for c in range(C):
        out = out + jnp.where(idx == c, cols[:, C + c * K:C + (c + 1) * K], 0.0)
    out_ref[...] = out


def _plan_tiles(N, D, C, K):
    """Pick (row tile TM, scoped-VMEM limit), generation-aware.

    Budgets what actually lives in VMEM: double-buffered int8 adj row tiles,
    double-buffered f32 outputs, single-buffered h / fused weights, and the
    per-chunk f32 upcast + accumulator scratch.
    """
    try:
        phys = pltpu.get_tpu_info().vmem_capacity_bytes
    except Exception:
        phys = 128 * 1024 * 1024
    # ~48 MiB on v7x (64 MiB physical), ~64 MiB on v5e/v6e (128 MiB physical).
    vmem_limit = (48 << 20) if phys <= (64 << 20) else (64 << 20)

    if N <= 256:
        # Whole row axis in one tiny block (splitting to 128-row tiles would
        # exceed N once rounded, so a single grid step is the best we can do).
        return N, vmem_limit

    resident = N * D * 4 + D * C * (K + 1) * 4        # h + fused W (Buffered(1))
    per_row = (2 * N                                   # adj int8, double-buffered
               + 2 * (K + D) * 4                       # out/fea f32, double-buffered
               + (min(_K_CHUNK, N) + D) * 4)           # chunk upcast + acc scratch
    budget = max(vmem_limit - resident - (2 << 20), per_row * 128)
    tm = min(N, budget // per_row)
    # Align to 256 rows (int8 sublane packing + MXU-friendly), floor at 128.
    tm = (tm // 256) * 256 if tm >= 256 else 128
    if tm >= N:
        # Keep >= 2 grid steps so the "parallel" axis can shard across v7x's
        # two TensorCores.
        tm = min(N, max(128, -(-((N + 1) // 2) // 128) * 128))
    return tm, vmem_limit


def gppt_forward(h, edge_index, w_struct, w_task):
    """h: (N, D) f32; edge_index: (2, E) int32; w_struct: (C, D); w_task: (C, K, D)."""
    N, D = h.shape
    C, K, _ = w_task.shape

    # --- glue (plain JAX): append self-loop edges iff none exist, scatter ---
    # directly into the final int8 adjacency, degrees via O(E+N) scatter.
    src, dst = edge_index[0], edge_index[1]
    has_self = jnp.any(src == dst)                     # contains_self_loops
    loop_w = jnp.where(has_self, 0, 1).astype(jnp.int8)
    loops = jnp.arange(N, dtype=src.dtype)
    src_all = jnp.concatenate([src, loops])
    dst_all = jnp.concatenate([dst, loops])
    vals = jnp.concatenate([jnp.ones(src.shape, jnp.int8),
                            jnp.broadcast_to(loop_w, (N,))])
    # int8 edge counts are exact for per-(dst, src) multiplicity <= 127.
    adj_i8 = jnp.zeros((N, N), jnp.int8).at[dst_all, src_all].add(vals)

    deg = jnp.zeros((N,), jnp.float32).at[dst_all].add(vals.astype(jnp.float32))
    # PyG 'mean' aggregation yields 0 (not NaN) for in-degree-0 nodes; guard.
    inv_deg = (1.0 / jnp.maximum(deg, 1.0)).reshape(N, 1)

    # StructureToken^T and all TaskToken heads fused into one (D, C + C*K)
    # matrix -> single MXU pass in the kernel, no in-kernel transposes.
    w_all = jnp.concatenate(
        [w_struct.T, jnp.transpose(w_task, (2, 0, 1)).reshape(D, C * K)], axis=1)

    TM, vmem_limit = _plan_tiles(N, D, C, K)
    grid = (pl.cdiv(N, TM),)

    out, fea = pl.pallas_call(
        gppt_forward_kernel,
        out_shape=(jax.ShapeDtypeStruct((N, K), jnp.float32),
                   jax.ShapeDtypeStruct((N, D), jnp.float32)),
        grid=grid,
        in_specs=[
            pl.BlockSpec((TM, N), lambda i: (i, 0)),            # adj rows (int8)
            pl.BlockSpec((TM, 1), lambda i: (i, 0)),            # 1/deg column
            # Grid-invariant operands: single-buffered (their block index never
            # changes; default double-buffering would just double VMEM use).
            pl.BlockSpec((N, D), lambda i: (0, 0),
                         pipeline_mode=pl.Buffered(1)),          # h (resident)
            pl.BlockSpec((D, C * (K + 1)), lambda i: (0, 0),
                         pipeline_mode=pl.Buffered(1)),          # fused weights
        ],
        out_specs=(
            pl.BlockSpec((TM, K), lambda i: (i, 0)),
            pl.BlockSpec((TM, D), lambda i: (i, 0)),
        ),
        compiler_params=pltpu.CompilerParams(
            dimension_semantics=("parallel",),
            vmem_limit_bytes=vmem_limit),
    )(adj_i8, inv_deg, h, w_all)
    return out, fea


def reference_forward(h, edge_index, w_struct, w_task):
    N = h.shape[0]
    src, dst = edge_index[0], edge_index[1]
    adj = jnp.zeros((N, N), jnp.float32).at[dst, src].add(1.0)
    adj = jnp.where(jnp.any(src == dst), adj, adj + jnp.eye(N, dtype=jnp.float32))
    deg = adj.sum(axis=1, keepdims=True)
    h_agg = (adj @ h) / jnp.maximum(deg, 1.0)
    scores = h_agg @ w_struct.T
    idx = jnp.argmax(scores, axis=1)
    out = jnp.einsum("nd,nkd->nk", h_agg, w_task[idx])
    return out, h_agg


if __name__ == "__main__":
    # Small, forward-consistent shapes.
    N = 16            # number of nodes
    n_hidden = 32     # D
    center_num = 4    # C
    n_classes = 6     # K
    E = 40            # number of (directed) edges

    key = jax.random.PRNGKey(0)
    k_h, k_src, k_dst, k_ws, k_wt = jax.random.split(key, 5)

    h = jax.random.normal(k_h, (N, n_hidden), dtype=jnp.float32)
    src = jax.random.randint(k_src, (E,), 0, N, dtype=jnp.int32)
    dst = jax.random.randint(k_dst, (E,), 0, N, dtype=jnp.int32)
    edge_index = jnp.stack([src, dst], axis=0)

    # Deterministic bias-free Linear weights (torch-style uniform(-1/sqrt(fan_in), ...)).
    bound_s = 1.0 / (n_hidden ** 0.5)
    w_struct = jax.random.uniform(k_ws, (center_num, n_hidden),
                                  minval=-bound_s, maxval=bound_s,
                                  dtype=jnp.float32)
    w_task = jax.random.uniform(k_wt, (center_num, n_classes, n_hidden),
                                minval=-bound_s, maxval=bound_s,
                                dtype=jnp.float32)

    out, fea = gppt_forward(h, edge_index, w_struct, w_task)
    out = jax.block_until_ready(out)
    fea = jax.block_until_ready(fea)

    out_ref, fea_ref = reference_forward(h, edge_index, w_struct, w_task)
    assert out.shape == (N, n_classes) and out.dtype == jnp.float32
    assert fea.shape == (N, n_hidden) and fea.dtype == jnp.float32
    assert jnp.allclose(fea, fea_ref, atol=1e-5, rtol=1e-5)
    assert jnp.allclose(out, out_ref, atol=1e-5, rtol=1e-5)

    print("KERNEL_OK")
</pallas_src>

<mosaic_0001>
module attributes {stable_mosaic.version = 11 : i64} {
  func.func @gppt_forward_kernel(%arg0: i32, %arg1: memref<16x16xi8, #tpu.memory_space<vmem>>, %arg2: memref<16x1xf32, #tpu.memory_space<vmem>>, %arg3: memref<16x32xf32, #tpu.memory_space<vmem>>, %arg4: memref<32x28xf32, #tpu.memory_space<vmem>>, %arg5: memref<16x6xf32, #tpu.memory_space<vmem>>, %arg6: memref<16x32xf32, #tpu.memory_space<vmem>>) attributes {dimension_semantics = [#tpu.dimension_semantics<parallel>], iteration_bounds = array<i64: 1>, scalar_prefetch = 0 : i64, scratch_operands = 0 : i64, tpu.core_type = #tpu.core_type<tc>, window_params = [{transform_indices = @transform_0, window_bounds = array<i64: 16, 16>}, {transform_indices = @transform_1, window_bounds = array<i64: 16, 1>}, {pipeline_mode = #tpu.pipeline_mode<synchronous>, transform_indices = @transform_2, window_bounds = array<i64: 16, 32>}, {pipeline_mode = #tpu.pipeline_mode<synchronous>, transform_indices = @transform_3, window_bounds = array<i64: 32, 28>}, {transform_indices = @transform_4, window_bounds = array<i64: 16, 6>}, {transform_indices = @transform_5, window_bounds = array<i64: 16, 32>}]} {
    %cst = arith.constant 0.000000e+00 : f32
    %0 = vector.broadcast %cst : f32 to vector<16x32xf32>
    %c0 = arith.constant 0 : index
    %c0_0 = arith.constant 0 : index
    %1 = vector.load %arg1[%c0, %c0_0] : memref<16x16xi8, #tpu.memory_space<vmem>>, vector<16x16xi8>
    %2 = arith.sitofp %1 : vector<16x16xi8> to vector<16x16xf32>
    %c0_1 = arith.constant 0 : index
    %c0_2 = arith.constant 0 : index
    %3 = vector.load %arg3[%c0_1, %c0_2] : memref<16x32xf32, #tpu.memory_space<vmem>>, vector<16x32xf32>
    %cst_3 = arith.constant dense<0.000000e+00> : vector<16x32xf32>
    %4 = tpu.matmul %2, %3, %cst_3 {dimension_numbers = #tpu.dot_dimension_numbers<[1], [0], [0], [1], [0, 0, 1, 1], [], []>} : vector<16x16xf32>, vector<16x32xf32>, vector<16x32xf32> -> vector<16x32xf32>
    %5 = arith.addf %0, %4 : vector<16x32xf32>
    %c0_4 = arith.constant 0 : index
    %c0_5 = arith.constant 0 : index
    %6 = vector.load %arg2[%c0_4, %c0_5] : memref<16x1xf32, #tpu.memory_space<vmem>>, vector<16x1xf32>
    %7 = vector.broadcast %6 : vector<16x1xf32> to vector<16x32xf32>
    %8 = arith.mulf %5, %7 : vector<16x32xf32>
    %c0_6 = arith.constant 0 : index
    %c0_7 = arith.constant 0 : index
    %9 = vector.load %arg6[%c0_6, %c0_7] : memref<16x32xf32, #tpu.memory_space<vmem>>, vector<16x32xf32>
    tpu.vector_store %arg6[%c0_6, %c0_7], %8 {strides = array<i32>} : memref<16x32xf32, #tpu.memory_space<vmem>>, vector<16x32xf32>,
    %c0_8 = arith.constant 0 : index
    %c0_9 = arith.constant 0 : index
    %10 = vector.load %arg4[%c0_8, %c0_9] : memref<32x28xf32, #tpu.memory_space<vmem>>, vector<32x28xf32>
    %cst_10 = arith.constant dense<0.000000e+00> : vector<16x28xf32>
    %11 = tpu.matmul %8, %10, %cst_10 {dimension_numbers = #tpu.dot_dimension_numbers<[1], [0], [0], [1], [0, 0, 1, 1], [], []>} : vector<16x32xf32>, vector<32x28xf32>, vector<16x28xf32> -> vector<16x28xf32>
    %12 = vector.extract_strided_slice %11 {offsets = [0, 0], sizes = [16, 4], strides = [1, 1]} : vector<16x28xf32> to vector<16x4xf32>
    %13 = tpu.iota {dimensions = array<i32: 1>} : vector<16x4xi32>
    %cst_11 = arith.constant dense<0xFF800000> : vector<16xf32>
    %14 = vector.multi_reduction <maximumf>, %12, %cst_11 [1] : vector<16x4xf32> to vector<16xf32>
    %15 = vector.shape_cast %14 : vector<16xf32> to vector<16x1xf32>
    %16 = vector.broadcast %15 : vector<16x1xf32> to vector<16x4xf32>
    %17 = arith.cmpf oeq, %12, %16 : vector<16x4xf32>
    %c4_i32 = arith.constant 4 : i32
    %18 = vector.broadcast %c4_i32 : i32 to vector<16x4xi32>
    %19 = arith.select %17, %13, %18 : vector<16x4xi1>, vector<16x4xi32>
    %cst_12 = arith.constant dense<2147483647> : vector<16xi32>
    %20 = vector.multi_reduction <minsi>, %19, %cst_12 [1] : vector<16x4xi32> to vector<16xi32>
    %21 = vector.shape_cast %20 : vector<16xi32> to vector<16x1xi32>
    %cst_13 = arith.constant 0.000000e+00 : f32
    %22 = vector.broadcast %cst_13 : f32 to vector<16x6xf32>
    %c0_i32 = arith.constant 0 : i32
    %23 = vector.broadcast %c0_i32 : i32 to vector<16x1xi32>
    %24 = arith.cmpi eq, %21, %23 : vector<16x1xi32>
    %25 = vector.extract_strided_slice %11 {offsets = [0, 4], sizes = [16, 6], strides = [1, 1]} : vector<16x28xf32> to vector<16x6xf32>
    %cst_14 = arith.constant 0.000000e+00 : f32
    %26 = vector.shape_cast %24 : vector<16x1xi1> to vector<16x1xi1>
    %27 = vector.broadcast %26 : vector<16x1xi1> to vector<16x6xi1>
    %28 = vector.broadcast %cst_14 : f32 to vector<16x6xf32>
    %29 = arith.select %27, %25, %28 : vector<16x6xi1>, vector<16x6xf32>
    %30 = arith.addf %22, %29 : vector<16x6xf32>
    %c1_i32 = arith.constant 1 : i32
    %31 = vector.broadcast %c1_i32 : i32 to vector<16x1xi32>
    %32 = arith.cmpi eq, %21, %31 : vector<16x1xi32>
    %33 = vector.extract_strided_slice %11 {offsets = [0, 10], sizes = [16, 6], strides = [1, 1]} : vector<16x28xf32> to vector<16x6xf32>
    %cst_15 = arith.constant 0.000000e+00 : f32
    %34 = vector.shape_cast %32 : vector<16x1xi1> to vector<16x1xi1>
    %35 = vector.broadcast %34 : vector<16x1xi1> to vector<16x6xi1>
    %36 = vector.broadcast %cst_15 : f32 to vector<16x6xf32>
    %37 = arith.select %35, %33, %36 : vector<16x6xi1>, vector<16x6xf32>
    %38 = arith.addf %30, %37 : vector<16x6xf32>
    %c2_i32 = arith.constant 2 : i32
    %39 = vector.broadcast %c2_i32 : i32 to vector<16x1xi32>
    %40 = arith.cmpi eq, %21, %39 : vector<16x1xi32>
    %41 = vector.extract_strided_slice %11 {offsets = [0, 16], sizes = [16, 6], strides = [1, 1]} : vector<16x28xf32> to vector<16x6xf32>
    %cst_16 = arith.constant 0.000000e+00 : f32
    %42 = vector.shape_cast %40 : vector<16x1xi1> to vector<16x1xi1>
    %43 = vector.broadcast %42 : vector<16x1xi1> to vector<16x6xi1>
    %44 = vector.broadcast %cst_16 : f32 to vector<16x6xf32>
    %45 = arith.select %43, %41, %44 : vector<16x6xi1>, vector<16x6xf32>
    %46 = arith.addf %38, %45 : vector<16x6xf32>
    %c3_i32 = arith.constant 3 : i32
    %47 = vector.broadcast %c3_i32 : i32 to vector<16x1xi32>
    %48 = arith.cmpi eq, %21, %47 : vector<16x1xi32>
    %49 = vector.extract_strided_slice %11 {offsets = [0, 22], sizes = [16, 6], strides = [1, 1]} : vector<16x28xf32> to vector<16x6xf32>
    %cst_17 = arith.constant 0.000000e+00 : f32
    %50 = vector.shape_cast %48 : vector<16x1xi1> to vector<16x1xi1>
    %51 = vector.broadcast %50 : vector<16x1xi1> to vector<16x6xi1>
    %52 = vector.broadcast %cst_17 : f32 to vector<16x6xf32>
    %53 = arith.select %51, %49, %52 : vector<16x6xi1>, vector<16x6xf32>
    %54 = arith.addf %46, %53 : vector<16x6xf32>
    %c0_18 = arith.constant 0 : index
    %c0_19 = arith.constant 0 : index
    %55 = vector.load %arg5[%c0_18, %c0_19] : memref<16x6xf32, #tpu.memory_space<vmem>>, vector<16x6xf32>
    tpu.vector_store %arg5[%c0_18, %c0_19], %54 {strides = array<i32>} : memref<16x6xf32, #tpu.memory_space<vmem>>, vector<16x6xf32>,
    return
  }
  func.func @transform_0(%arg0: i32) -> (i32, i32) {
    %c0_i32 = arith.constant 0 : i32
    %c0_i32_0 = arith.constant 0 : i32
    return %arg0, %c0_i32 : i32, i32
  }
  func.func @transform_1(%arg0: i32) -> (i32, i32) {
    %c0_i32 = arith.constant 0 : i32
    %c0_i32_0 = arith.constant 0 : i32
    return %arg0, %c0_i32 : i32, i32
  }
  func.func @transform_2(%arg0: i32) -> (i32, i32) {
    %c0_i32 = arith.constant 0 : i32
    %c0_i32_0 = arith.constant 0 : i32
    %c0_i32_1 = arith.constant 0 : i32
    return %c0_i32, %c0_i32_0 : i32, i32
  }
  func.func @transform_3(%arg0: i32) -> (i32, i32) {
    %c0_i32 = arith.constant 0 : i32
    %c0_i32_0 = arith.constant 0 : i32
    %c0_i32_1 = arith.constant 0 : i32
    return %c0_i32, %c0_i32_0 : i32, i32
  }
  func.func @transform_4(%arg0: i32) -> (i32, i32) {
    %c0_i32 = arith.constant 0 : i32
    %c0_i32_0 = arith.constant 0 : i32
    return %arg0, %c0_i32 : i32, i32
  }
  func.func @transform_5(%arg0: i32) -> (i32, i32) {
    %c0_i32 = arith.constant 0 : i32
    %c0_i32_0 = arith.constant 0 : i32
    return %arg0, %c0_i32 : i32, i32
  }
}

</mosaic_0001>

<bundles_post_ra>
// kernel: tpu_custom_call.1
= control target key start
LH: loop header
LB: loop body
LE: loop exit
PB: predicated region body
PF: predicated region fallthrough
CT: control target
= control target key end

     0   :  { %11 = vsyncpa [#allocation3], 0  ;;  %s482_s0 = inlined_call_operand.hbm [shape: s8[16,16], index: 0, kind: input, shape index: {}]   ;;  %s483_s1 = inlined_call_operand.vmem [shape: f32[16,1], index: 1, kind: input, shape index: {}]   ;;  %s484_s2 = inlined_call_operand.vmem [shape: f32[16,32], index: 2, kind: input, shape index: {}]   ;;  %s485_s3 = inlined_call_operand.hbm [shape: f32[32,28], index: 3, kind: input, shape index: {}]   ;;  %s486_s4 = inlined_call_operand.vmem [shape: f32[16,6], index: 4, kind: output, shape index: {0}]   ;;  %s487_s5 = inlined_call_operand.hbm [shape: f32[16,32], index: 5, kind: output, shape index: {1}]  }
   0x1   :  { %12 = vsyncpa [#allocation6], 0 }
   0x2   :  { %13 = vsyncpa [#allocation4], 0  ;;  %s18_s20 = sshll.u32 %s482_s0, 4  ;;  %s387_s21 = smov [#allocation2]   ;;  %s19_s20 = int_to_ptr.hbm [resolvable:$true] %s18_s20 }
   0x3   :  { %s20_s22 = sshll.u32 %s387_s21, 4  ;;  %s35_s25 = sshll.u32 %s485_s3, 4  ;;  %s21_s22 = int_to_ptr.vmem [resolvable:$true] %s20_s22  ;;  %s36_s25 = int_to_ptr.hbm [resolvable:$true] %s35_s25 }
   0x4   :  { %s388_s26 = smov 32   ;;  %s389_s27 = smov 2  }
   0x5   :  { %26 = dma.hbm_to_vmem [thread:$0]  %s19_s20, 64, %s21_s22, [#allocation3], %s388_s26, %s388_s26, %s389_s27  }
   0x6   :  { %s390_s28 = smov [#allocation5]   ;;  %s391_s30 = smov 128  }
   0x7   :  { %s37_s29 = sshll.u32 %s390_s28, 4  ;;  %s392_s6 = smov 8   ;;  %s38_s29 = int_to_ptr.vmem [resolvable:$true] %s37_s29 }
   0x8   :  { %43 = dma.hbm_to_vmem [thread:$0]  %s36_s25, 512, %s38_s29, [#allocation6], %s391_s30, %s391_s30, %s392_s6  }
   0x9   :  { %381 = dma.done.wait [#allocation3], 64  }
   0xa   :  { %382 = vsyncadd [#allocation3], 4294967232 }
   0xb   :  { %383 = dma.done.wait [#allocation6], 512  }
   0xc   :  { %384 = vsyncadd [#allocation6], 4294966784  ;;  %v393_v0 = vmov 0   ;;  %v59_v1 = vld [vmem:[%s484_s2 + $0x8] sm:$0xff]  ;;  %v58_v3 = vld [vmem:[%s484_s2] sm:$0xff]  ;;  %vm60_vm0 = vcmask 130048   ;;  %v140_v24 = vlaneseq }
   0xd   :  { %308 = vset.pattern.permute.xlu0 %v393_v0  ;;  %v91_v2 = vld [vmem:[%s483_s1 + $0x8] sm:$0xff]  ;;  %81 = vmatpush.msra.mxu0 %v59_v1  ;;  %v287_v4 = vld [vmem:[#allocation2] sm:$0xf]   ;;  %v109_v11 = vld [vmem:[#allocation5 + $0x10] sm:$0xff]  ;;  %vm104_vm1 = vcmask 261120   ;;  %vm142_vm2 = vcmask 31744  }
   0xe   :  { %290 = vmatpush.msra.mxu3 %v59_v1  ;;  %99 = vperm.xlu0 %308, %v91_v2   ;;  %v288_v5 = vunpack.c.0.s8 %v287_v4  ;;  %v289_v6 = vunpack.c.1.s8 %v287_v4  ;;  %v90_v9 = vld [vmem:[%s483_s1] sm:$0xff]  ;;  %v108_v12 = vld [vmem:[#allocation5 + $0x8] sm:$0xff]  ;;  %v141_v25 = vand.u32 127, %v140_v24  ;;  %s394_s1 = smov 122   ;;  %s395_s2 = smov 116   ;;  %vm255_vm15 = vcmask 48128  }
   0xf   :  { %82 = vmatpush.msra.mxu0 %v58_v3  ;;  %v110_v10 = vld [vmem:[#allocation5 + $0x18] sm:$0xff]  ;;  %v107_v13 = vld [vmem:[#allocation5] sm:$0xff]  ;;  %s396_s13 = smov 110   ;;  %s397_s14 = smov [#allocation7]  }
  0x10   :  { %291 = vmatpush.msra.mxu3 %v58_v3  ;;  %v56_v7 = vcvt.s32.f32 %v288_v5  ;;  %v57_v8 = vcvt.s32.f32 %v289_v6  ;;  %129 = vmatpush.msra.mxu1 %v110_v10  ;;  %s264_s15 = sshll.u32 %s397_s14, 4  ;;  %s266_s18 = sshll.u32 %s487_s5, 4  ;;  %s265_s15 = int_to_ptr.vmem [resolvable:$true] %s264_s15  ;;  %s267_s18 = int_to_ptr.hbm [resolvable:$true] %s266_s18 }
  0x11   :  { %292 = vmatpush.msra.mxu2 %v110_v10  ;;  %s398_s5 = smov 124  }
  0x12   :  { %282 = vmatmul.msk.f32.vlgmr.msra.gmra.mxu0 %vm60_vm0, %v56_v7  ;;  %283 = vmatmul.msk.f32.vlgmr.msra.gmra.mxu3 %vm60_vm0, %v57_v8 }
  0x13   :  { %130 = vmatpush.msra.mxu1 %v109_v11  ;;  %293 = vmatpush.msra.mxu2 %v109_v11 }
  0x15   :  { %131 = vmatpush.msra.mxu1 %v108_v12  ;;  %294 = vmatpush.msra.mxu2 %v108_v12 }
  0x16   :  { %94 = vperm.xlu0 %308, %v90_v9  }
  0x17   :  { %132 = vmatpush.msra.mxu1 %v107_v13  ;;  %295 = vmatpush.msra.mxu2 %v107_v13 }
  0x80   :  { %v100_v14 = vpop.permute.xlu0 %99 }
  0x88   :  { %v95_v15 = vpop.permute.xlu0 %94 }
  0x8f   :  { %v84_v16 = vpop.f32.mrf.mxu0 }
  0x90   :  { %v102_v17 = vmul.f32 %v95_v15, %v84_v16 }
  0x92   :  { %284 = vmatmul.msk.f32.vlgmr.msra.gmra.mxu1 %vm104_vm1, %v102_v17  ;;  %105 = vst.msk [vmem:[#allocation7] sm:$0xff] %vm104_vm1, %v102_v17 }
  0x95   :  { %v87_v18 = vpop.f32.mrf.mxu3 }
  0x96   :  { %v103_v19 = vmul.f32 %v100_v14, %v87_v18 }
  0x98   :  { %106 = vst.msk [vmem:[#allocation7 + $0x8] sm:$0xff] %vm104_vm1, %v103_v19  ;;  %285 = vmatmul.msk.f32.vlgmr.msra.gmra.mxu2 %vm104_vm1, %v103_v19 }
  0x99   :  { %272 = dma.vmem_to_hbm [thread:$0]  %s265_s15, 256, %s267_s18, [#allocation4], %s391_s30, %s391_s30, %s392_s6  }
 0x10f   :  { %v450_v20 = vpop.f32.mrf.mxu1 }
 0x110   :  { %v143_v21 = vsel %vm142_vm2, %v450_v20, -inf }
 0x111   :  { %144 = vmax.xlane.f32.xlu1 %v143_v21 }
 0x11b   :  { %v454_v22 = vpop.f32.mrf.mxu2 }
 0x11c   :  { %v146_v23 = vsel %vm142_vm2, %v454_v22, -inf }
 0x11d   :  { %147 = vmax.xlane.f32.xlu1 %v146_v23 }
 0x184   :  { %v145_v26 = vpop.xlane.xlu1 %144 }
 0x185   :  { %vm149_vm3 = vcmp.eq.f32.partialorder %v450_v20, %v145_v26 }
 0x186   :  { %v151_v27 = vsel %vm149_vm3, %v141_v25, 4 }
 0x187   :  { %v153_v28 = vsel %vm142_vm2, %v151_v27, 2147483647 }
 0x188   :  { %v155_v29 = vshra.s32 %v153_v28, 16  ;;  %v154_v36 = vand.u32 65535, %v153_v28 }
 0x18a   :  { %v157_v30 = vcvt.s32.f32 %v155_v29  ;;  %v156_v38 = vcvt.s32.f32 %v154_v36 }
 0x18c   :  { %158 = vmin.xlane.f32.xlu2 %v157_v30 }
 0x190   :  { %v148_v31 = vpop.xlane.xlu1 %147 }
 0x191   :  { %vm150_vm4 = vcmp.eq.f32.partialorder %v454_v22, %v148_v31 }
 0x192   :  { %v152_v32 = vsel %vm150_vm4, %v141_v25, 4 }
 0x193   :  { %v168_v33 = vsel %vm142_vm2, %v152_v32, 2147483647 }
 0x194   :  { %v170_v34 = vshra.s32 %v168_v33, 16  ;;  %v169_v40 = vand.u32 65535, %v168_v33 }
 0x196   :  { %v172_v35 = vcvt.s32.f32 %v170_v34  ;;  %v171_v42 = vcvt.s32.f32 %v169_v40 }
 0x198   :  { %173 = vmin.xlane.f32.xlu2 %v172_v35 }
 0x1ff   :  { %v159_v37 = vpop.xlane.xlu2 %158 }
 0x200   :  { %vm160_vm5 = vcmp.eq.f32.partialorder %v157_v30, %v159_v37  ;;  %v165_v44 = vcvt.f32.s32 %v159_v37 }
 0x201   :  { %v161_v39 = vsel %vm160_vm5, %v156_v38, inf }
 0x202   :  { %162 = vmin.xlane.f32.xlu0 %v161_v39  ;;  %v166_v46 = vshll.u32 %v165_v44, 16 }
 0x20b   :  { %v174_v41 = vpop.xlane.xlu2 %173 }
 0x20c   :  { %vm175_vm6 = vcmp.eq.f32.partialorder %v172_v35, %v174_v41  ;;  %v180_v50 = vcvt.f32.s32 %v174_v41 }
 0x20d   :  { %v176_v43 = vsel %vm175_vm6, %v171_v42, inf }
 0x20e   :  { %177 = vmin.xlane.f32.xlu1 %v176_v43  ;;  %v181_v52 = vshll.u32 %v180_v50, 16 }
 0x275   :  { %v163_v45 = vpop.xlane.xlu0 %162 }
 0x276   :  { %v164_v47 = vcvt.f32.s32 %v163_v45 }
 0x278   :  { %v167_v48 = vadd.s32 %v166_v46, %v164_v47 }
 0x27a   :  { %vm193_vm7 = vcmp.eq.s32.totalorder %v167_v48, 1  ;;  %vm211_vm8 = vcmp.eq.s32.totalorder %v167_v48, 2  ;;  %vm229_vm11 = vcmp.eq.s32.totalorder %v167_v48, 3  ;;  %vm183_vm14 = vcmp.eq.s32.totalorder %v167_v48, 0 }
 0x27b   :  { %v199_v49 = vsel %vm193_vm7, %v450_v20, 0.0  ;;  %v217_v54 = vsel %vm211_vm8, %v450_v20, 0.0  ;;  %v235_v58 = vsel %vm229_vm11, %v450_v20, 0.0  ;;  %v189_v3 = vsel %vm183_vm14, %v450_v20, 0.0 }
 0x27c   :  { %203 = vrot.lane.b32.xlu2 %v199_v49, %s394_s1 }
 0x281   :  { %v178_v51 = vpop.xlane.xlu1 %177 }
 0x282   :  { %v179_v53 = vcvt.f32.s32 %v178_v51 }
 0x284   :  { %v182_v55 = vadd.s32 %v181_v52, %v179_v53  ;;  %221 = vrot.lane.b32.xlu2 %v217_v54, %s395_s2 }
 0x286   :  { %vm194_vm9 = vcmp.eq.s32.totalorder %v182_v55, 1  ;;  %vm212_vm10 = vcmp.eq.s32.totalorder %v182_v55, 2  ;;  %vm230_vm12 = vcmp.eq.s32.totalorder %v182_v55, 3  ;;  %vm184_vm13 = vcmp.eq.s32.totalorder %v182_v55, 0 }
 0x287   :  { %v200_v56 = vsel %vm194_vm9, %v454_v22, 0.0  ;;  %v218_v57 = vsel %vm212_vm10, %v454_v22, 0.0  ;;  %v236_v59 = vsel %vm230_vm12, %v454_v22, 0.0  ;;  %v190_v0 = vsel %vm184_vm13, %v454_v22, 0.0 }
 0x288   :  { %205 = vrot.lane.b32.xlu1 %v200_v56, %s394_s1 }
 0x28c   :  { %223 = vrot.lane.b32.xlu2 %v218_v57, %s395_s2 }
 0x290   :  { %239 = vrot.lane.b32.xlu1 %v235_v58, %s396_s13 }
 0x294   :  { %241 = vrot.lane.b32.xlu2 %v236_v59, %s396_s13 }
 0x2d6   :  { %v204_v60 = vpop.permute.xlu2 %203 }
 0x2d7   :  { %v209_v5 = vadd.f32 %v204_v60, %v189_v3 }
 0x2de   :  { %v222_v61 = vpop.permute.xlu2 %221 }
 0x2df   :  { %v227_v7 = vadd.f32 %v222_v61, %v209_v5 }
 0x2e6   :  { %v224_v62 = vpop.permute.xlu2 %223 }
 0x2ee   :  { %v242_v4 = vpop.permute.xlu2 %241 }
 0x2fa   :  { %v206_v63 = vpop.permute.xlu1 %205 }
 0x2fb   :  { %v210_v1 = vadd.f32 %v206_v63, %v190_v0 }
 0x2fd   :  { %v228_v2 = vadd.f32 %v224_v62, %v210_v1 }
 0x2ff   :  { %v246_v6 = vadd.f32 %v242_v4, %v228_v2 }
 0x301   :  { %251 = vrot.lane.b32.xlu0 %v246_v6, %s398_s5 }
 0x302   :  { %v240_v8 = vpop.permute.xlu1 %239 }
 0x303   :  { %v245_v9 = vadd.f32 %v240_v8, %v227_v7 }
 0x305   :  { %249 = vrot.lane.b32.xlu1 %v245_v9, %s398_s5 }
 0x373   :  { %v252_v10 = vpop.permute.xlu0 %251 }
 0x374   :  { %257 = vst.msk [vmem:[%s486_s4 + $0x8] sm:$0xff] %vm255_vm15, %v252_v10 }
 0x377   :  { %v250_v11 = vpop.permute.xlu1 %249 }
 0x378   :  { %256 = vst.msk [vmem:[%s486_s4] sm:$0xff] %vm255_vm15, %v250_v11 }
 0x379   :  { %385 = dma.done.wait [#allocation4], 256  }
 0x37a   :  { %386 = vsyncadd [#allocation4], 4294967040 }
 0x37b   :  { %279 = vsyncpa [#allocation3], 1 }
 0x37c   :  { %280 = vsyncpa [#allocation6], 1 }
 0x37d   :  { %281 = vsyncpa [#allocation4], 1 }

</bundles_post_ra>
